<compile_context>
chip_gen: v5e
topology: v5e:2x2
jax: 0.10.0
libtpu: 0.0.40
codegen_flags: <defaults>
</compile_context>

<pallas_src>
import jax
import jax.numpy as jnp
from jax.experimental import pallas as pl
from jax.experimental.pallas import tpu as pltpu


def _adapter_kernel(x_ref, w_ref, b_ref, o_ref):
    # x_ref: (C_in, TL)  w_ref: (C_out, C_in)  b_ref: (C_out, 1)  o_ref: (C_out, TL)
    w = w_ref[...].astype(jnp.float32)
    c_out, c_in = w.shape
    tl = x_ref.shape[-1]
    bias = b_ref[...].astype(jnp.float32)            # (C_out, 1)

    if c_in <= 16:
        # Degenerate-K "matmul" as unrolled broadcast FMAs on the VPU.
        # Cast only the channel row being used (keeps vreg pressure low;
        # matters when inputs are bf16).
        acc = jnp.broadcast_to(bias, (c_out, tl))
        for ci in range(c_in):
            row = x_ref[pl.ds(ci, 1), :].astype(jnp.float32)   # (1, TL)
            acc = acc + w[:, ci:ci + 1] * row
    else:
        x = x_ref[...].astype(jnp.float32)
        acc = jnp.dot(w, x, preferred_element_type=jnp.float32) + bias

    y = jnp.where(acc > 0, acc, 0.2 * acc)           # LeakyReLU(negative_slope=0.2)
    o_ref[...] = y.astype(o_ref.dtype)


def _pick_spatial_tile(hw, batch, c_in, c_out, dtype, max_tile=65536):
    """Pick the spatial (lane-axis) tile length TL.

    * A multiple of 128 whenever hw >= 128 (lane-dense stores; only the
      ragged tail block, if any, is masked).
    * Capped so double-buffered in+out blocks stay inside ~24 MiB of scoped
      VMEM on every generation (v5e/v6e/v7x).
    * Shrunk if needed so the parallel grid has >= 2 steps (2-TC split on v7x).
    """
    if hw < 128:
        return hw                                    # full-extent block, always legal
    bytes_per = max(jnp.dtype(dtype).itemsize, 4)    # f32 working copies in-kernel
    vmem_budget = 24 * 1024 * 1024
    cap = vmem_budget // ((c_in + c_out) * bytes_per * 2)
    cap = max(128, (cap // 128) * 128)
    tl = min(max_tile, cap, (hw // 128) * 128)
    # Guarantee >= 2 total grid steps so both v7x TensorCores get work.
    if batch * pl.cdiv(hw, tl) < 2 and hw > 128:
        half = -(-hw // 2)
        tl = max(128, ((half + 127) // 128) * 128)
    return tl


def _adapter_block_pallas(x3, weight_oc_ic, bias_col):
    """x3: (B, C_in, HW); weight_oc_ic: (C_out, C_in); bias_col: (C_out, 1)."""
    B, C_in, HW = x3.shape
    C_out = weight_oc_ic.shape[0]
    TL = _pick_spatial_tile(HW, B, C_in, C_out, x3.dtype)
    grid = (B, pl.cdiv(HW, TL))

    return pl.pallas_call(
        _adapter_kernel,
        out_shape=jax.ShapeDtypeStruct((B, C_out, HW), x3.dtype),
        grid_spec=pltpu.PrefetchScalarGridSpec(
            num_scalar_prefetch=0,
            grid=grid,
            in_specs=[
                # batch dim squeezed out; spatial tile on the lane axis.
                pl.BlockSpec((None, C_in, TL), lambda b, j: (b, 0, j)),
                pl.BlockSpec((C_out, C_in), lambda b, j: (0, 0)),
                pl.BlockSpec((C_out, 1), lambda b, j: (0, 0)),
            ],
            out_specs=pl.BlockSpec((None, C_out, TL), lambda b, j: (b, 0, j)),
        ),
        compiler_params=pltpu.CompilerParams(
            dimension_semantics=("parallel", "parallel"),
            vmem_limit_bytes=32 * 1024 * 1024,
        ),
    )(x3, weight_oc_ic, bias_col)


@jax.jit
def adapter_block_forward(x_nchw, weight_oc_ic, bias):
    """Equivalent of AdapterBlock.forward.

    x_nchw: (B, C_in, H, W)
    weight_oc_ic: (C_out, C_in)   -- squeezed 1x1 conv weight
    bias: (C_out,)
    returns: (B, C_out, H, W)
    """
    B, C_in, H, W = x_nchw.shape
    C_out = weight_oc_ic.shape[0]

    x3 = x_nchw.reshape(B, C_in, H * W)              # contiguous reshape: free
    y3 = _adapter_block_pallas(x3, weight_oc_ic, bias.reshape(C_out, 1))
    return y3.reshape(B, C_out, H, W)                # contiguous reshape: free


def init_params(key, img_channels, output_channels):
    """Deterministic init matching PyTorch Conv2d default init bounds."""
    k_w, k_b = jax.random.split(key)
    fan_in = img_channels * 1 * 1
    bound = 1.0 / jnp.sqrt(fan_in)
    # Conv2d weight shape is (C_out, C_in, 1, 1); we keep the squeezed form.
    weight = jax.random.uniform(
        k_w, (output_channels, img_channels), jnp.float32, -bound, bound)
    bias = jax.random.uniform(
        k_b, (output_channels,), jnp.float32, -bound, bound)
    return weight, bias


def _leaky_ref(x, weight, bias):
    y = jnp.einsum("bchw,oc->bohw", x, weight) + bias[None, :, None, None]
    return jnp.where(y > 0, y, 0.2 * y)


if __name__ == "__main__":
    key = jax.random.PRNGKey(0)
    k_x, k_x2, k_p = jax.random.split(key, 3)

    B, C_in, H, W = 2, 4, 16, 16
    C_out = 8

    x = jax.random.normal(k_x, (B, C_in, H, W), jnp.float32)
    weight, bias = init_params(k_p, C_in, C_out)

    out = adapter_block_forward(x, weight, bias)
    out = jax.block_until_ready(out)
    assert out.shape == (B, C_out, H, W)
    assert jnp.allclose(out, _leaky_ref(x, weight, bias), atol=1e-5, rtol=1e-5)

    # Ragged spatial extent (HW not a multiple of TL) exercises the cdiv grid
    # with a masked tail block.
    H2, W2 = 18, 18
    x2 = jax.random.normal(k_x2, (1, C_in, H2, W2), jnp.float32)
    out2 = adapter_block_forward(x2, weight, bias)
    out2 = jax.block_until_ready(out2)
    assert out2.shape == (1, C_out, H2, W2)
    assert jnp.allclose(out2, _leaky_ref(x2, weight, bias), atol=1e-5, rtol=1e-5)

    print("KERNEL_OK")
</pallas_src>

<mosaic_0001>
module attributes {stable_mosaic.version = 11 : i64} {
  func.func @_adapter_kernel(%arg0: i32, %arg1: i32, %arg2: memref<1x4x256xf32, #tpu.memory_space<vmem>>, %arg3: memref<8x4xf32, #tpu.memory_space<vmem>>, %arg4: memref<8x1xf32, #tpu.memory_space<vmem>>, %arg5: memref<1x8x256xf32, #tpu.memory_space<vmem>>) attributes {dimension_semantics = [#tpu.dimension_semantics<parallel>, #tpu.dimension_semantics<parallel>], iteration_bounds = array<i64: 2, 1>, scalar_prefetch = 0 : i64, scratch_operands = 0 : i64, tpu.core_type = #tpu.core_type<tc>, window_params = [{transform_indices = @transform_0, window_bounds = array<i64: 1, 4, 256>}, {pipeline_mode = #tpu.pipeline_mode<synchronous>, transform_indices = @transform_1, window_bounds = array<i64: 8, 4>}, {pipeline_mode = #tpu.pipeline_mode<synchronous>, transform_indices = @transform_2, window_bounds = array<i64: 8, 1>}, {transform_indices = @transform_3, window_bounds = array<i64: 1, 8, 256>}]} {
    %c0 = arith.constant 0 : index
    %c0_0 = arith.constant 0 : index
    %0 = vector.load %arg3[%c0, %c0_0] : memref<8x4xf32, #tpu.memory_space<vmem>>, vector<8x4xf32>
    %c0_1 = arith.constant 0 : index
    %c0_2 = arith.constant 0 : index
    %1 = vector.load %arg4[%c0_1, %c0_2] : memref<8x1xf32, #tpu.memory_space<vmem>>, vector<8x1xf32>
    %2 = vector.shape_cast %1 : vector<8x1xf32> to vector<8x1xf32>
    %3 = vector.broadcast %2 : vector<8x1xf32> to vector<8x256xf32>
    %c0_3 = arith.constant 0 : index
    %c0_4 = arith.constant 0 : index
    %c0_5 = arith.constant 0 : index
    %4 = vector.load %arg2[%c0_3, %c0_4, %c0_5] : memref<1x4x256xf32, #tpu.memory_space<vmem>>, vector<1x1x256xf32>
    %5 = vector.shape_cast %4 : vector<1x1x256xf32> to vector<1x256xf32>
    %6 = vector.extract_strided_slice %0 {offsets = [0, 0], sizes = [8, 1], strides = [1, 1]} : vector<8x4xf32> to vector<8x1xf32>
    %7 = vector.broadcast %6 : vector<8x1xf32> to vector<8x256xf32>
    %8 = vector.broadcast %5 : vector<1x256xf32> to vector<8x256xf32>
    %9 = arith.mulf %7, %8 : vector<8x256xf32>
    %10 = arith.addf %3, %9 : vector<8x256xf32>
    %c0_6 = arith.constant 0 : index
    %c1 = arith.constant 1 : index
    %c0_7 = arith.constant 0 : index
    %11 = vector.load %arg2[%c0_6, %c1, %c0_7] : memref<1x4x256xf32, #tpu.memory_space<vmem>>, vector<1x1x256xf32>
    %12 = vector.shape_cast %11 : vector<1x1x256xf32> to vector<1x256xf32>
    %13 = vector.extract_strided_slice %0 {offsets = [0, 1], sizes = [8, 1], strides = [1, 1]} : vector<8x4xf32> to vector<8x1xf32>
    %14 = vector.broadcast %13 : vector<8x1xf32> to vector<8x256xf32>
    %15 = vector.broadcast %12 : vector<1x256xf32> to vector<8x256xf32>
    %16 = arith.mulf %14, %15 : vector<8x256xf32>
    %17 = arith.addf %10, %16 : vector<8x256xf32>
    %c0_8 = arith.constant 0 : index
    %c2 = arith.constant 2 : index
    %c0_9 = arith.constant 0 : index
    %18 = vector.load %arg2[%c0_8, %c2, %c0_9] : memref<1x4x256xf32, #tpu.memory_space<vmem>>, vector<1x1x256xf32>
    %19 = vector.shape_cast %18 : vector<1x1x256xf32> to vector<1x256xf32>
    %20 = vector.extract_strided_slice %0 {offsets = [0, 2], sizes = [8, 1], strides = [1, 1]} : vector<8x4xf32> to vector<8x1xf32>
    %21 = vector.broadcast %20 : vector<8x1xf32> to vector<8x256xf32>
    %22 = vector.broadcast %19 : vector<1x256xf32> to vector<8x256xf32>
    %23 = arith.mulf %21, %22 : vector<8x256xf32>
    %24 = arith.addf %17, %23 : vector<8x256xf32>
    %c0_10 = arith.constant 0 : index
    %c3 = arith.constant 3 : index
    %c0_11 = arith.constant 0 : index
    %25 = vector.load %arg2[%c0_10, %c3, %c0_11] : memref<1x4x256xf32, #tpu.memory_space<vmem>>, vector<1x1x256xf32>
    %26 = vector.shape_cast %25 : vector<1x1x256xf32> to vector<1x256xf32>
    %27 = vector.extract_strided_slice %0 {offsets = [0, 3], sizes = [8, 1], strides = [1, 1]} : vector<8x4xf32> to vector<8x1xf32>
    %28 = vector.broadcast %27 : vector<8x1xf32> to vector<8x256xf32>
    %29 = vector.broadcast %26 : vector<1x256xf32> to vector<8x256xf32>
    %30 = arith.mulf %28, %29 : vector<8x256xf32>
    %31 = arith.addf %24, %30 : vector<8x256xf32>
    %cst = arith.constant 0.000000e+00 : f32
    %32 = vector.broadcast %cst : f32 to vector<8x256xf32>
    %33 = arith.cmpf ogt, %31, %32 : vector<8x256xf32>
    %cst_12 = arith.constant 2.000000e-01 : f32
    %34 = vector.broadcast %cst_12 : f32 to vector<8x256xf32>
    %35 = arith.mulf %34, %31 : vector<8x256xf32>
    %36 = arith.select %33, %31, %35 : vector<8x256xi1>, vector<8x256xf32>
    %c0_13 = arith.constant 0 : index
    %c0_14 = arith.constant 0 : index
    %c0_15 = arith.constant 0 : index
    %37 = vector.load %arg5[%c0_13, %c0_14, %c0_15] : memref<1x8x256xf32, #tpu.memory_space<vmem>>, vector<1x8x256xf32>
    %38 = vector.shape_cast %37 : vector<1x8x256xf32> to vector<8x256xf32>
    %39 = vector.shape_cast %36 : vector<8x256xf32> to vector<1x8x256xf32>
    tpu.vector_store %arg5[%c0_13, %c0_14, %c0_15], %39 {strides = array<i32>} : memref<1x8x256xf32, #tpu.memory_space<vmem>>, vector<1x8x256xf32>,
    return
  }
  func.func @transform_0(%arg0: i32, %arg1: i32) -> (i32, i32, i32) {
    %c0_i32 = arith.constant 0 : i32
    %c0_i32_0 = arith.constant 0 : i32
    return %arg0, %c0_i32, %arg1 : i32, i32, i32
  }
  func.func @transform_1(%arg0: i32, %arg1: i32) -> (i32, i32) {
    %c0_i32 = arith.constant 0 : i32
    %c0_i32_0 = arith.constant 0 : i32
    %c0_i32_1 = arith.constant 0 : i32
    return %c0_i32, %c0_i32_0 : i32, i32
  }
  func.func @transform_2(%arg0: i32, %arg1: i32) -> (i32, i32) {
    %c0_i32 = arith.constant 0 : i32
    %c0_i32_0 = arith.constant 0 : i32
    %c0_i32_1 = arith.constant 0 : i32
    return %c0_i32, %c0_i32_0 : i32, i32
  }
  func.func @transform_3(%arg0: i32, %arg1: i32) -> (i32, i32, i32) {
    %c0_i32 = arith.constant 0 : i32
    %c0_i32_0 = arith.constant 0 : i32
    return %arg0, %c0_i32, %arg1 : i32, i32, i32
  }
}

</mosaic_0001>

<bundles_post_ra>
// kernel: adapter_block_forward.1
= control target key start
LH: loop header
LB: loop body
LE: loop exit
PB: predicated region body
PF: predicated region fallthrough
CT: control target
= control target key end

     0   :  { %s469_s12 = smov 0   ;;  %s471_s13 = smov 0   ;;  %s512_s0 = inlined_call_operand.vmem [shape: f32[2,4,256], index: 0, kind: input, shape index: {}]   ;;  %s513_s1 = inlined_call_operand.vmem [shape: f32[8,4], index: 1, kind: input, shape index: {}]   ;;  %s514_s2 = inlined_call_operand.vmem [shape: f32[8,1], index: 2, kind: input, shape index: {}]   ;;  %s515_s3 = inlined_call_operand.vmem [shape: f32[2,8,256], index: 3, kind: output, shape index: {}]  }
   0x1   :  { %s473_s14 = smov 0  }
   0x2 LB: > { %s25_s15 = sadd.s32 1, %s439_s13  ;;  %p376_p0 = scmp.ge.s32.totalorder %s443_s14, 1  ;;  %s443_s14 = sphi %s473_s14, %s13_s14   ;;  %s439_s13 = sphi %s471_s13, %s517_s13   ;;  %s435_s12 = sphi %s469_s12, %s516_s12  }
   0x3   : > { %p27_p1 = scmp.ge.s32.totalorder %s25_s15, 2  ;;  %p158_p2 = scmp.lt.s32.totalorder %s443_s14, 3 }
   0x5   : > { %s519_s15 = smov (%p27_p1, %s25_s15), 0  ;;  %p159_p3 = pnand %p376_p0, %p158_p2 }
   0x6   : > { %p191_p4 = scmp.lt.s32.totalorder (!%p159_p3), %s435_s12, 1 }
   0x7   : > { %162 = sbr.rel (%p159_p3) target bundleno = 150 (0x96), region = 32 }
   0xc   : > { %v210_v0 = vld [vmem:[%s513_s1] sm:$0xff]  ;;  %v445_v1 = vmov 0   ;;  %v446_v2 = vmov 1   ;;  %v447_v3 = vmov 3   ;;  %v448_v5 = vmov 2   ;;  %s521_s12 = smov (!%p191_p4, %s435_s12), 1 }
   0xd   : > { %416 = vset.pattern.permute.xlu0 %v445_v1  ;;  %417 = vset.pattern.permute.xlu1 %v446_v2  ;;  %v211_v4 = vld [vmem:[%s514_s2] sm:$0xff]  ;;  %s386_s20 = sshll.u32 %s521_s12, 3  ;;  %s387_s24 = sshll.u32 %s521_s12, 4 }
   0xe   : > { %220 = vperm.xlu0 %416, %v210_v0   ;;  %235 = vperm.xlu1 %417, %v210_v0   ;;  %s198_s23 = scalar_lea.vmem %s512_s0, %s386_s20  ;;  %s208_s27 = scalar_lea.vmem %s515_s3, %s387_s24 }
   0xf   : > { %419 = vset.pattern.permute.xlu2 %v447_v3  ;;  %v217_v7 = vld [vmem:[%s198_s23] ss:$4 sm:$0x3]  ;;  %v381_v9 = vld [vmem:[%s198_s23 + $0x1] ss:$4 sm:$0x3] }
  0x10   : > { %265 = vperm.xlu2 %419, %v210_v0   ;;  %v224_v10 = vperm.slane %v217_v7, 0  ;;  %v225_v11 = vperm.slane %v217_v7, 1  ;;  %v382_v12 = vld [vmem:[%s198_s23 + $0x2] ss:$4 sm:$0x3]  ;;  %v239_v14 = vperm.slane %v381_v9, 0 }
  0x11   : > { %v383_v13 = vld [vmem:[%s198_s23 + $0x3] ss:$4 sm:$0x3]  ;;  %v240_v15 = vperm.slane %v381_v9, 1  ;;  %v254_v16 = vperm.slane %v382_v12, 0  ;;  %v255_v17 = vperm.slane %v382_v12, 1 }
  0x12   : > { %v269_v20 = vperm.slane %v383_v13, 0  ;;  %v270_v21 = vperm.slane %v383_v13, 1 }
  0x16   : > { %214 = vperm.xlu0 %416, %v211_v4   ;;  %418 = vset.pattern.permute.xlu1 %v448_v5 }
  0x17   : > { %250 = vperm.xlu1 %418, %v210_v0  }
  0x1e   : > { %420 = vset.pattern.permute.xlu0 %v447_v3 }
  0x6a   : > { %v266_v23 = vpop.permute.xlu2 %265 }
  0x6b   : > { %v273_v33 = vmul.f32 %v269_v20, %v266_v23  ;;  %v274_v34 = vmul.f32 %v270_v21, %v266_v23 }
  0x80   : > { %v221_v6 = vpop.permute.xlu0 %220  ;;  %v236_v8 = vpop.permute.xlu1 %235 }
  0x81   : > { %v228_v18 = vmul.f32 %v224_v10, %v221_v6  ;;  %v229_v19 = vmul.f32 %v225_v11, %v221_v6  ;;  %v243_v24 = vmul.f32 %v239_v14, %v236_v8  ;;  %v244_v25 = vmul.f32 %v240_v15, %v236_v8 }
  0x88   : > { %v215_v22 = vpop.permute.xlu0 %214 }
  0x89   : > { %v230_v26 = vadd.f32 %v228_v18, %v215_v22  ;;  %v231_v27 = vadd.f32 %v229_v19, %v215_v22  ;;  %v251_v28 = vpop.permute.xlu1 %250 }
  0x8a   : > { %v258_v29 = vmul.f32 %v254_v16, %v251_v28  ;;  %v259_v30 = vmul.f32 %v255_v17, %v251_v28 }
  0x8b   : > { %v245_v31 = vadd.f32 %v243_v24, %v230_v26  ;;  %v246_v32 = vadd.f32 %v244_v25, %v231_v27 }
  0x8d   : > { %v260_v35 = vadd.f32 %v258_v29, %v245_v31  ;;  %v261_v36 = vadd.f32 %v259_v30, %v246_v32 }
  0x8f   : > { %v275_v37 = vadd.f32 %v273_v33, %v260_v35  ;;  %v276_v38 = vadd.f32 %v274_v34, %v261_v36 }
  0x91   : > { %vm277_vm0 = vcmp.gt.f32.partialorder %v275_v37, 0.0  ;;  %vm278_vm1 = vcmp.gt.f32.partialorder %v276_v38, 0.0  ;;  %v279_v39 = vmul.f32 0.2, %v275_v37  ;;  %v280_v40 = vmul.f32 0.2, %v276_v38 }
  0x93   : > { %v281_v41 = vsel %vm277_vm0, %v275_v37, %v279_v39  ;;  %v282_v42 = vsel %vm278_vm1, %v276_v38, %v280_v40 }
  0x94   : > { %283 = vst [vmem:[%s208_s27] sm:$0xff] %v281_v41 }
  0x95   : > { %284 = vst [vmem:[%s208_s27 + $0x8] sm:$0xff] %v282_v42 }
  0x96 PF: > { %s13_s14 = sadd.s32 1, %s443_s14   ;;  %s516_s12 = smov %s439_s13 }
  0x97   : > { %p10_p5 = scmp.ge.s32.totalorder %s13_s14, 4   ;;  %s517_s13 = smov %s519_s15 }
  0x99   :  { %12 = sbr.rel (!%p10_p5) target bundleno = 2 (0x2), region = 65 }

</bundles_post_ra>
